<compile_context>
chip_gen: v7x
topology: tpu7x:2x2x1
jax: 0.10.0
libtpu: 0.0.40
codegen_flags: <defaults>
</compile_context>

<pallas_src>
import functools

import jax
import jax.numpy as jnp
from jax.experimental import pallas as pl
from jax.experimental.pallas import tpu as pltpu

LANE = 128        # vreg lane width (last dim of every block)
TM_MAX = 1024     # max rows per grid step; 1024*128*4B = 512 KiB/input tile
                  # (2 inputs x 2 pipeline buffers + 2 f32 accs ~= 3 MiB VMEM)
N_CHUNKS_MAX = 2  # v7x has 2 TensorCores; outer "parallel" axis shards the reduction


def _round_up(x, m):
    return (x + m - 1) // m * m


def _ce_nanmean_kernel(alpha_ref, x_ref, t_ref, sum_ref, cnt_ref,
                       acc_sum, acc_cnt, *, n_total, tm, inner, mask_tail):
    """Accumulate nan-masked (sum, count) of -alpha * target * log(x + eps)."""
    c = pl.program_id(0)   # chunk (parallel across TensorCores)
    i = pl.program_id(1)   # step within chunk (reduction axis)

    @pl.when(i == 0)
    def _init():
        acc_sum[...] = jnp.zeros_like(acc_sum)
        acc_cnt[...] = jnp.zeros_like(acc_cnt)

    alpha = alpha_ref[0]
    x = x_ref[...].astype(jnp.float32)
    t = t_ref[...].astype(jnp.float32)
    loss = -alpha * (t * jnp.log(x + jnp.float32(1e-9)))

    # nanmean mask: drop NaN elements ...
    valid = jnp.logical_not(jnp.isnan(loss))
    if mask_tail:
        # ... and drop anything beyond the true element count (tail padding,
        # partial last block, or clamped/duplicated over-coverage blocks).
        # Static branch: only emitted when needed.
        blk = c * inner + i   # logical (unclamped) row-block index
        row = jax.lax.broadcasted_iota(jnp.int32, (tm, LANE), 0) + blk * tm
        col = jax.lax.broadcasted_iota(jnp.int32, (tm, LANE), 1)
        valid = jnp.logical_and(valid, (row * LANE + col) < n_total)

    zero = jnp.float32(0.0)
    acc_sum[...] += jnp.where(valid, loss, zero)
    acc_cnt[...] += valid.astype(jnp.float32)

    @pl.when(i == pl.num_programs(1) - 1)
    def _finalize():
        sum_ref[0, 0] = jnp.sum(acc_sum[...])
        cnt_ref[0, 0] = jnp.sum(acc_cnt[...])


@jax.jit
def cross_entropy_loss_aw(inp, target, alpha=1.0):
    """Pallas implementation of CrossEntropyLoss_aw.forward."""
    n = inp.size
    xf = inp.reshape(-1)
    tf = target.reshape(-1)

    # View as a sublane-aligned (rows, 128) slab. Pad (statically, and only when
    # needed) to a multiple of 8*LANE; pad values are irrelevant because the
    # kernel masks by flat index. For typical NCHW sizes this is a no-op.
    padded = _round_up(n, 8 * LANE)
    if padded != n:
        xf = jnp.pad(xf, (0, padded - n))
        tf = jnp.pad(tf, (0, padded - n))

    rows = padded // LANE                  # multiple of 8
    tm = min(TM_MAX, rows)                 # multiple of 8 (or == rows)
    steps_total = pl.cdiv(rows, tm)        # row blocks in the whole slab
    n_chunks = N_CHUNKS_MAX if steps_total >= N_CHUNKS_MAX else 1
    inner = pl.cdiv(steps_total, n_chunks)  # row blocks per chunk
    last_blk = steps_total - 1
    # Mask needed if the (chunked) grid coverage over-shoots the true size.
    mask_tail = (n_chunks * inner * tm * LANE) != n

    x2 = xf.reshape(rows, LANE)
    t2 = tf.reshape(rows, LANE)
    alpha_arr = jnp.asarray([alpha], dtype=jnp.float32)

    kernel = functools.partial(
        _ce_nanmean_kernel, n_total=n, tm=tm, inner=inner, mask_tail=mask_tail)

    def in_map(c, i, alpha):
        # Clamp so an over-covering final step re-reads a valid block instead of
        # issuing an OOB DMA; its contribution is removed by the flat-index mask.
        return (jnp.minimum(c * inner + i, last_blk), 0)

    sum_out, cnt_out = pl.pallas_call(
        kernel,
        out_shape=(
            jax.ShapeDtypeStruct((n_chunks, 1), jnp.float32),
            jax.ShapeDtypeStruct((n_chunks, 1), jnp.float32),
        ),
        grid_spec=pltpu.PrefetchScalarGridSpec(
            num_scalar_prefetch=1,   # alpha lands in SMEM
            grid=(n_chunks, inner),
            in_specs=[
                pl.BlockSpec((tm, LANE), in_map),
                pl.BlockSpec((tm, LANE), in_map),
            ],
            out_specs=[
                pl.BlockSpec((1, 1), lambda c, i, alpha: (c, 0),
                             memory_space=pltpu.SMEM),
                pl.BlockSpec((1, 1), lambda c, i, alpha: (c, 0),
                             memory_space=pltpu.SMEM),
            ],
            scratch_shapes=[
                pltpu.VMEM((tm, LANE), jnp.float32),   # running sum
                pltpu.VMEM((tm, LANE), jnp.float32),   # running count
            ],
        ),
        compiler_params=pltpu.CompilerParams(
            dimension_semantics=("parallel", "arbitrary"),
        ),
    )(alpha_arr, x2, t2)

    # nanmean = sum(non-NaN) / count(non-NaN); 0/0 -> NaN matches torch.nanmean
    return jnp.sum(sum_out) / jnp.sum(cnt_out)


def _reference(inp, target, alpha=1.0):
    eps = 1e-09
    loss = -alpha * (target.astype(jnp.float32)
                     * jnp.log(inp.astype(jnp.float32) + eps))
    mask = jnp.logical_not(jnp.isnan(loss))
    return jnp.sum(jnp.where(mask, loss, 0.0)) / jnp.sum(mask)


if __name__ == "__main__":
    key = jax.random.PRNGKey(0)
    k1, k2, k3, k4 = jax.random.split(key, 4)

    # NCHW-shaped "prediction" (softmax probabilities over channel axis) and
    # one-hot targets, like a segmentation loss would see.
    B, C, H, W = 2, 4, 16, 16
    logits = jax.random.normal(k1, (B, C, H, W), dtype=jnp.float32)
    inp = jax.nn.softmax(logits, axis=1)                       # input probs
    tgt_idx = jax.random.randint(k2, (B, H, W), 0, C)
    target = jax.nn.one_hot(tgt_idx, C, axis=1, dtype=jnp.float32)
    # Inject NaNs so the nanmean masking path is actually exercised.
    inp = inp.at[0, 0, 0, 0].set(jnp.nan)
    inp = inp.at[1, 2, 3, 4].set(jnp.nan)

    out = jax.block_until_ready(cross_entropy_loss_aw(inp, target, alpha=1.0))
    ref = _reference(inp, target, alpha=1.0)
    assert jnp.allclose(out, ref, rtol=1e-5, atol=1e-6), (out, ref)

    # Second check: bf16 inputs, >1024 rows -> exercises the 2-chunk parallel
    # split, the partial last block, and the flat-index tail mask.
    B2, C2, H2, W2 = 2, 4, 128, 144     # 147456 elems -> 1152 rows of 128 lanes
    logits2 = jax.random.normal(k3, (B2, C2, H2, W2), dtype=jnp.float32)
    inp2 = jax.nn.softmax(logits2, axis=1).astype(jnp.bfloat16)
    tgt_idx2 = jax.random.randint(k4, (B2, H2, W2), 0, C2)
    target2 = jax.nn.one_hot(tgt_idx2, C2, axis=1, dtype=jnp.bfloat16)

    out2 = jax.block_until_ready(cross_entropy_loss_aw(inp2, target2, alpha=0.5))
    ref2 = _reference(inp2, target2, alpha=0.5)
    assert jnp.allclose(out2, ref2, rtol=1e-3, atol=1e-4), (out2, ref2)

    print("KERNEL_OK")
</pallas_src>

<mosaic_0001>
module attributes {stable_mosaic.version = 11 : i64} {
  func.func @_ce_nanmean_kernel(%arg0: i32, %arg1: i32, %arg2: memref<1xf32, #tpu.memory_space<smem>>, %arg3: memref<16x128xf32, #tpu.memory_space<vmem>>, %arg4: memref<16x128xf32, #tpu.memory_space<vmem>>, %arg5: memref<1x1xf32, #tpu.memory_space<smem>>, %arg6: memref<1x1xf32, #tpu.memory_space<smem>>, %arg7: memref<16x128xf32, #tpu.memory_space<vmem>>, %arg8: memref<16x128xf32, #tpu.memory_space<vmem>>) attributes {dimension_semantics = [#tpu.dimension_semantics<parallel>, #tpu.dimension_semantics<arbitrary>], iteration_bounds = array<i64: 1, 1>, scalar_prefetch = 1 : i64, scratch_operands = 2 : i64, tpu.core_type = #tpu.core_type<tc>, window_params = [{transform_indices = @transform_0, window_bounds = array<i64: 16, 128>}, {transform_indices = @transform_1, window_bounds = array<i64: 16, 128>}, {transform_indices = @transform_2, window_bounds = array<i64: 1, 1>}, {transform_indices = @transform_3, window_bounds = array<i64: 1, 1>}]} {
    %c0_i32 = arith.constant 0 : i32
    %0 = arith.cmpi eq, %arg1, %c0_i32 : i32
    %1 = arith.extui %0 : i1 to i32
    %c0_i32_0 = arith.constant 0 : i32
    %2 = arith.cmpi ne, %1, %c0_i32_0 : i32
    scf.if %2 {
      %cst_18 = arith.constant 0.000000e+00 : f32
      %28 = vector.broadcast %cst_18 : f32 to vector<16x128xf32>
      %c0_19 = arith.constant 0 : index
      %c0_20 = arith.constant 0 : index
      %29 = vector.load %arg7[%c0_19, %c0_20] : memref<16x128xf32, #tpu.memory_space<vmem>>, vector<16x128xf32>
      tpu.vector_store %arg7[%c0_19, %c0_20], %28 {strides = array<i32>} : memref<16x128xf32, #tpu.memory_space<vmem>>, vector<16x128xf32>,
      %cst_21 = arith.constant 0.000000e+00 : f32
      %30 = vector.broadcast %cst_21 : f32 to vector<16x128xf32>
      %c0_22 = arith.constant 0 : index
      %c0_23 = arith.constant 0 : index
      %31 = vector.load %arg8[%c0_22, %c0_23] : memref<16x128xf32, #tpu.memory_space<vmem>>, vector<16x128xf32>
      tpu.vector_store %arg8[%c0_22, %c0_23], %30 {strides = array<i32>} : memref<16x128xf32, #tpu.memory_space<vmem>>, vector<16x128xf32>,
    } else {
    }
    %c0 = arith.constant 0 : index
    %3 = memref.load %arg2[%c0] : memref<1xf32, #tpu.memory_space<smem>>
    %c0_1 = arith.constant 0 : index
    %c0_2 = arith.constant 0 : index
    %4 = vector.load %arg3[%c0_1, %c0_2] : memref<16x128xf32, #tpu.memory_space<vmem>>, vector<16x128xf32>
    %c0_3 = arith.constant 0 : index
    %c0_4 = arith.constant 0 : index
    %5 = vector.load %arg4[%c0_3, %c0_4] : memref<16x128xf32, #tpu.memory_space<vmem>>, vector<16x128xf32>
    %cst = arith.constant 0.000000e+00 : f32
    %6 = arith.subf %cst, %3 : f32
    %cst_5 = arith.constant 9.99999971E-10 : f32
    %7 = vector.broadcast %cst_5 : f32 to vector<16x128xf32>
    %8 = arith.addf %4, %7 : vector<16x128xf32>
    %9 = math.log %8 : vector<16x128xf32>
    %10 = arith.mulf %5, %9 : vector<16x128xf32>
    %11 = vector.broadcast %6 : f32 to vector<16x128xf32>
    %12 = arith.mulf %11, %10 : vector<16x128xf32>
    %13 = arith.cmpf one, %12, %12 : vector<16x128xf32>
    %cst_6 = arith.constant dense<true> : vector<16x128xi1>
    %14 = arith.xori %13, %cst_6 : vector<16x128xi1>
    %c0_7 = arith.constant 0 : index
    %c0_8 = arith.constant 0 : index
    %15 = vector.load %arg7[%c0_7, %c0_8] : memref<16x128xf32, #tpu.memory_space<vmem>>, vector<16x128xf32>
    %cst_9 = arith.constant 0.000000e+00 : f32
    %16 = vector.broadcast %cst_9 : f32 to vector<16x128xf32>
    %17 = arith.select %14, %12, %16 : vector<16x128xi1>, vector<16x128xf32>
    %18 = arith.addf %15, %17 : vector<16x128xf32>
    %c0_10 = arith.constant 0 : index
    %c0_11 = arith.constant 0 : index
    %19 = vector.load %arg7[%c0_10, %c0_11] : memref<16x128xf32, #tpu.memory_space<vmem>>, vector<16x128xf32>
    tpu.vector_store %arg7[%c0_10, %c0_11], %18 {strides = array<i32>} : memref<16x128xf32, #tpu.memory_space<vmem>>, vector<16x128xf32>,
    %c0_12 = arith.constant 0 : index
    %c0_13 = arith.constant 0 : index
    %20 = vector.load %arg8[%c0_12, %c0_13] : memref<16x128xf32, #tpu.memory_space<vmem>>, vector<16x128xf32>
    %21 = arith.extui %14 : vector<16x128xi1> to vector<16x128xi32>
    %22 = arith.sitofp %21 : vector<16x128xi32> to vector<16x128xf32>
    %23 = arith.addf %20, %22 : vector<16x128xf32>
    %c0_14 = arith.constant 0 : index
    %c0_15 = arith.constant 0 : index
    %24 = vector.load %arg8[%c0_14, %c0_15] : memref<16x128xf32, #tpu.memory_space<vmem>>, vector<16x128xf32>
    tpu.vector_store %arg8[%c0_14, %c0_15], %23 {strides = array<i32>} : memref<16x128xf32, #tpu.memory_space<vmem>>, vector<16x128xf32>,
    %c0_i32_16 = arith.constant 0 : i32
    %25 = arith.cmpi eq, %arg1, %c0_i32_16 : i32
    %26 = arith.extui %25 : i1 to i32
    %c0_i32_17 = arith.constant 0 : i32
    %27 = arith.cmpi ne, %26, %c0_i32_17 : i32
    scf.if %27 {
      %c0_18 = arith.constant 0 : index
      %c0_19 = arith.constant 0 : index
      %28 = vector.load %arg7[%c0_18, %c0_19] : memref<16x128xf32, #tpu.memory_space<vmem>>, vector<16x128xf32>
      %29 = vector.shape_cast %28 : vector<16x128xf32> to vector<1x16x128xf32>
      %cst_20 = arith.constant dense<0.000000e+00> : vector<1xf32>
      %30 = vector.multi_reduction <add>, %29, %cst_20 [1, 2] : vector<1x16x128xf32> to vector<1xf32>
      %31 = vector.shape_cast %30 : vector<1xf32> to vector<1x1x1xf32>
      %32 = vector.extract %31[0, 0, 0] : f32 from vector<1x1x1xf32>
      %c0_21 = arith.constant 0 : index
      %c0_22 = arith.constant 0 : index
      %33 = memref.load %arg5[%c0_21, %c0_22] : memref<1x1xf32, #tpu.memory_space<smem>>
      memref.store %32, %arg5[%c0_21, %c0_22] : memref<1x1xf32, #tpu.memory_space<smem>>
      %c0_23 = arith.constant 0 : index
      %c0_24 = arith.constant 0 : index
      %34 = vector.load %arg8[%c0_23, %c0_24] : memref<16x128xf32, #tpu.memory_space<vmem>>, vector<16x128xf32>
      %35 = vector.shape_cast %34 : vector<16x128xf32> to vector<1x16x128xf32>
      %cst_25 = arith.constant dense<0.000000e+00> : vector<1xf32>
      %36 = vector.multi_reduction <add>, %35, %cst_25 [1, 2] : vector<1x16x128xf32> to vector<1xf32>
      %37 = vector.shape_cast %36 : vector<1xf32> to vector<1x1x1xf32>
      %38 = vector.extract %37[0, 0, 0] : f32 from vector<1x1x1xf32>
      %c0_26 = arith.constant 0 : index
      %c0_27 = arith.constant 0 : index
      %39 = memref.load %arg6[%c0_26, %c0_27] : memref<1x1xf32, #tpu.memory_space<smem>>
      memref.store %38, %arg6[%c0_26, %c0_27] : memref<1x1xf32, #tpu.memory_space<smem>>
    } else {
    }
    return
  }
  func.func @transform_0(%arg0: i32, %arg1: i32, %arg2: memref<1xf32, #tpu.memory_space<smem>>) -> (i32, i32) {
    %c1_i32 = arith.constant 1 : i32
    %0 = arith.muli %arg0, %c1_i32 : i32
    %1 = arith.addi %0, %arg1 : i32
    %c0_i32 = arith.constant 0 : i32
    %2 = arith.minsi %1, %c0_i32 : i32
    %c0_i32_0 = arith.constant 0 : i32
    %c0_i32_1 = arith.constant 0 : i32
    return %2, %c0_i32_0 : i32, i32
  }
  func.func @transform_1(%arg0: i32, %arg1: i32, %arg2: memref<1xf32, #tpu.memory_space<smem>>) -> (i32, i32) {
    %c1_i32 = arith.constant 1 : i32
    %0 = arith.muli %arg0, %c1_i32 : i32
    %1 = arith.addi %0, %arg1 : i32
    %c0_i32 = arith.constant 0 : i32
    %2 = arith.minsi %1, %c0_i32 : i32
    %c0_i32_0 = arith.constant 0 : i32
    %c0_i32_1 = arith.constant 0 : i32
    return %2, %c0_i32_0 : i32, i32
  }
  func.func @transform_2(%arg0: i32, %arg1: i32, %arg2: memref<1xf32, #tpu.memory_space<smem>>) -> (i32, i32) {
    %c0_i32 = arith.constant 0 : i32
    %c0_i32_0 = arith.constant 0 : i32
    return %arg0, %c0_i32 : i32, i32
  }
  func.func @transform_3(%arg0: i32, %arg1: i32, %arg2: memref<1xf32, #tpu.memory_space<smem>>) -> (i32, i32) {
    %c0_i32 = arith.constant 0 : i32
    %c0_i32_0 = arith.constant 0 : i32
    return %arg0, %c0_i32 : i32, i32
  }
}

</mosaic_0001>

<bundles_post_ra>
// kernel: cross_entropy_loss_aw.1
= control target key start
LH: loop header
LB: loop body
LE: loop exit
PB: predicated region body
PF: predicated region fallthrough
CT: control target
= control target key end

     0   :  { %11 = vsyncpa [#allocation7], 0  ;;  %s302_s0 = inlined_call_operand.<no memory space> [shape: f32[1], index: 0, kind: input, shape index: {}]   ;;  %s303_s1 = inlined_call_operand.vmem [shape: f32[16,128], index: 1, kind: input, shape index: {}]   ;;  %s304_s2 = inlined_call_operand.vmem [shape: f32[16,128], index: 2, kind: input, shape index: {}]   ;;  %s305_s3 = inlined_call_operand.hbm [shape: f32[1,1], index: 3, kind: output, shape index: {0}]   ;;  %s306_s4 = inlined_call_operand.hbm [shape: f32[1,1], index: 4, kind: output, shape index: {1}]  }
   0x1   :  { %v90_v0 = vld [vmem:[%s303_s1] sm:$0xff]  ;;  %v91_v1 = vld [vmem:[%s303_s1 + $0x8] sm:$0xff] }
   0x2   :  { %v95_v2 = vadd.f32 1e-09, %v90_v0  ;;  %v96_v3 = vadd.f32 1e-09, %v91_v1 }
   0x3   :  { %12 = vsyncpa [#allocation9], 0  ;;  %s94_s21 = ssub.f32 0.0, %s302_s0  ;;  %v92_v5 = vld [vmem:[%s304_s2] sm:$0xff]  ;;  %v93_v7 = vld [vmem:[%s304_s2 + $0x8] sm:$0xff]  ;;  %vm234_vm2 = vmmov 1  }
   0x4   :  { %206 = vlog2.f32 %v95_v2  ;;  %v235_v17 = vmov 0.0   ;;  %s210_s26 = scalar_lea.hbm %s305_s3, 16 }
   0x5   :  { %208 = vlog2.f32 %v96_v3  ;;  %v103_v10 = vstv %s94_s21  ;;  %p211_p0 = scmp.ne.s32.totalorder %s305_s3, %s210_s26  ;;  %p214_p1 = scmp.lt.u32.totalorder %s210_s26, %s305_s3 }
   0x7   :  { %p216_p2 = pnand %p214_p1, %p211_p0 }
   0xe   :  { %v207_v4 = vpop.eup %206 }
   0xf   :  { %v209_v6 = vpop.eup %208  ;;  %v98_v8 = vmul.f32 0.6931472, %v207_v4 }
  0x10   :  { %v100_v9 = vmul.f32 0.6931472, %v209_v6 }
  0x11   :  { %v101_v11 = vmul.f32 %v98_v8, %v92_v5 }
  0x12   :  { %v102_v12 = vmul.f32 %v100_v9, %v93_v7 }
  0x13   :  { %v104_v13 = vmul.f32 %v103_v10, %v101_v11 }
  0x14   :  { %v105_v14 = vmul.f32 %v103_v10, %v102_v12 }
  0x15   :  { %vm106_vm0 = vcmp.ne.f32.partialorder %v104_v13, %v104_v13 }
  0x16   :  { %vm107_vm1 = vcmp.ne.f32.partialorder %v105_v14, %v105_v14  ;;  %vm108_vm3 = vmxor %vm106_vm0, %vm234_vm2 }
  0x17   :  { %vm109_vm4 = vmxor %vm107_vm1, %vm234_vm2  ;;  %v112_v15 = vsel %vm108_vm3, %v104_v13, 0.0  ;;  %v196_v18 = vsel %vm108_vm3, 1.0, %v235_v17 }
  0x18   :  { %v113_v16 = vsel %vm109_vm4, %v105_v14, 0.0  ;;  %v197_v19 = vsel %vm109_vm4, 1.0, %v235_v17 }
  0x19   :  { %v133_v20 = vadd.f32 %v113_v16, %v112_v15  ;;  %v147_v21 = vadd.f32 %v197_v19, %v196_v18 }
  0x1b   :  { %134 = vadd.xlane.f32.xlu0 %v133_v20 }
  0x1f   :  { %148 = vadd.xlane.f32.xlu0 %v147_v21 }
  0xa8   :  { %v135_v22 = vpop.xlane.xlu0 %134 }
  0xa9   :  { %v136_v23 = vrot.slane %v135_v22, 4 }
  0xab   :  { %v137_v24 = vadd.f32 %v136_v23, %v135_v22 }
  0xac   :  { %v149_v25 = vpop.xlane.xlu0 %148 }
  0xad   :  { %v138_v26 = vrot.slane %v137_v24, 2  ;;  %v150_v27 = vrot.slane %v149_v25, 4 }
  0xaf   :  { %v151_v28 = vadd.f32 %v150_v27, %v149_v25  ;;  %v139_v29 = vadd.f32 %v138_v26, %v137_v24 }
  0xb1   :  { %v152_v30 = vrot.slane %v151_v28, 2  ;;  %v140_v31 = vrot.slane %v139_v29, 1 }
  0xb3   :  { %v153_v32 = vadd.f32 %v152_v30, %v151_v28  ;;  %v141_v33 = vadd.f32 %v140_v31, %v139_v29 }
  0xb5   :  { %198 = vpush %v141_v33  ;;  %v154_v34 = vrot.slane %v153_v32, 1 }
  0xb7   :  { %v155_v35 = vadd.f32 %v154_v34, %v153_v32 }
  0xb9   :  { %200 = vpush %v155_v35 }
  0xe6   :  { %s199_s0 = spop %198 }
  0xe7   :  { %144 = sst [smem:[#allocation6]] %s199_s0 }
  0xe8   :  { %219 = shalt.err (!%p216_p2)
}
  0xe9   :  { %s236_s5 = smov [#allocation6]   ;;  %s220_s11 = scalar_lea.hbm %s306_s4, 16 }
  0xea   :  { %166 = dma.smem_to_hbm %s236_s5, 16, %s305_s3, [#allocation7]  }
  0xeb   :  { %s201_s8 = spop %200  ;;  %p221_p3 = scmp.ne.s32.totalorder %s306_s4, %s220_s11 }
  0xec   :  { %158 = sst [smem:[#allocation8]] %s201_s8  ;;  %p224_p4 = scmp.lt.u32.totalorder %s220_s11, %s306_s4 }
  0xee   :  { %p226_p5 = pnand %p224_p4, %p221_p3 }
  0xf0   :  { %229 = shalt.err (!%p226_p5)
}
  0xf1   :  { %s237_s16 = smov [#allocation8]  }
  0xf2   :  { %174 = dma.smem_to_hbm %s237_s16, 16, %s306_s4, [#allocation9]  }
  0xf3   :  { %230 = dma.done.wait [#allocation7], 16  }
  0xf4   :  { %231 = vsyncadd [#allocation7], 4294967280 }
  0xf5   :  { %232 = dma.done.wait [#allocation9], 16  }
  0xf6   :  { %233 = vsyncadd [#allocation9], 4294967280 }
  0xf7   :  { %181 = sfence }
  0xf8   :  { %182 = vsyncpa [#allocation7], 1 }
  0xf9   :  { %183 = vsyncpa [#allocation9], 1 }

</bundles_post_ra>
